<compile_context>
chip_gen: v5e
topology: v5e:2x2
jax: 0.10.0
libtpu: 0.0.40
codegen_flags: <defaults>
</compile_context>

<pallas_src>
import jax
import jax.numpy as jnp
from jax import lax
from jax.experimental import pallas as pl
from jax.experimental.pallas import tpu as pltpu


_EPS = 1e-12
# x (M, K) . w (N, K) -> (M, N)  ==  x @ w.T  (contract last dims, no transpose)
_CONTRACT_LAST = (((1,), (1,)), ((), ()))


def _drug_prep_kernel(zd_ref, wd_ref, dn_ref):
    """One-shot hoisted drug side: unit-norm centered drug projections.

    zd_ref : (ND, H1)  bf16, drug rows of encode_output (zero-padded to ND rows)
    wd_ref : (H2, H1)  bf16, W_drug in PyTorch nn.Linear layout
    dn_ref : (ND, H2)  bf16, centered, unit-row-norm drug features
    """
    drug = lax.dot_general(zd_ref[...], wd_ref[...], _CONTRACT_LAST,
                           preferred_element_type=jnp.float32)
    drug_c = drug - jnp.mean(drug, axis=1, keepdims=True)
    inv_d = lax.rsqrt(jnp.sum(drug_c * drug_c, axis=1, keepdims=True) + _EPS)
    # zero-padded drug rows -> drug_c == 0 -> dn == 0 (harmless, sliced away)
    dn_ref[...] = (drug_c * inv_d).astype(dn_ref.dtype)


def _gdecoder_kernel(alpha_ref, zc_ref, wc_ref, dn_ref, out_ref):
    """One cell-row tile: project, center, normalize, correlate, sigmoid.

    alpha_ref : (1,)      f32, SMEM scalar
    zc_ref    : (TM, H1)  bf16 cell-row tile of encode_output
    wc_ref    : (H2, H1)  bf16 W_cell (resident, nn.Linear layout)
    dn_ref    : (ND, H2)  bf16 precomputed drug_n (resident)
    out_ref   : (TM, ND)  bf16 sigmoid(alpha * corr), lane-dense
    """
    alpha = alpha_ref[0]

    # nn.Linear (no bias): x @ W.T — bf16 MXU matmul, f32 accumulation.
    cell = lax.dot_general(zc_ref[...], wc_ref[...], _CONTRACT_LAST,
                           preferred_element_type=jnp.float32)

    # Row-wise Pearson: center, scale each row to unit norm; alpha folded into
    # the cell-side scale so one matmul directly yields alpha * corr.
    cell_c = cell - jnp.mean(cell, axis=1, keepdims=True)
    inv_c = lax.rsqrt(jnp.sum(cell_c * cell_c, axis=1, keepdims=True) + _EPS)
    cell_n = (cell_c * (alpha * inv_c)).astype(jnp.bfloat16)

    scaled = lax.dot_general(cell_n, dn_ref[...], _CONTRACT_LAST,
                             preferred_element_type=jnp.float32)

    # Exact sigmoid with a single EUP transcendental: sigmoid(x) = 0.5*tanh(0.5x)+0.5
    out_ref[...] = (0.5 * jnp.tanh(0.5 * scaled) + 0.5).astype(out_ref.dtype)


def _round_up(x, m):
    return ((x + m - 1) // m) * m


def gdecoder_forward(encode_output, w_cell, w_drug, n_cell, n_drug, alpha):
    """encode_output: (n_cell + n_drug, n_hid1) f32
       w_cell, w_drug: (n_hid2, n_hid1) f32 (PyTorch nn.Linear weight layout)
       returns: (n_cell, n_drug) f32 = sigmoid(alpha * pearson(cell, drug))
    """
    n_hid1 = encode_output.shape[1]
    n_hid2 = w_cell.shape[0]

    ND = _round_up(n_drug, 128)          # lane-dense output width

    # Grid collapsed: one tile up to 512 cell rows; 512-row tiles beyond
    # (512 is a multiple of 16 -> valid bf16 sublane tiling).
    MAX_TM = 512
    if n_cell <= MAX_TM:
        TM, NC = n_cell, n_cell          # block == full array dims, no row pad
    else:
        TM = MAX_TM
        NC = _round_up(n_cell, TM)

    bf16 = jnp.bfloat16
    zc = encode_output[:n_cell].astype(bf16)
    if NC != n_cell:
        zc = jnp.pad(zc, ((0, NC - n_cell), (0, 0)))
    zd = jnp.pad(encode_output[n_cell:n_cell + n_drug].astype(bf16),
                 ((0, ND - n_drug), (0, 0)))
    wc = w_cell.astype(bf16)
    wd = w_drug.astype(bf16)
    alpha_arr = jnp.asarray([alpha], dtype=jnp.float32)

    # Hoisted drug side: computed exactly once, reused by every cell tile.
    drug_n = pl.pallas_call(
        _drug_prep_kernel,
        out_shape=jax.ShapeDtypeStruct((ND, n_hid2), bf16),
    )(zd, wd)

    out_padded = pl.pallas_call(
        _gdecoder_kernel,
        out_shape=jax.ShapeDtypeStruct((NC, ND), bf16),
        grid=(NC // TM,),
        in_specs=[
            pl.BlockSpec(memory_space=pltpu.MemorySpace.SMEM),   # alpha scalar
            pl.BlockSpec((TM, n_hid1), lambda i: (i, 0)),        # z_cell tile
            pl.BlockSpec((n_hid2, n_hid1), lambda i: (0, 0)),    # W_cell (resident)
            pl.BlockSpec((ND, n_hid2), lambda i: (0, 0)),        # drug_n (resident)
        ],
        out_specs=pl.BlockSpec((TM, ND), lambda i: (i, 0)),
        compiler_params=pltpu.CompilerParams(
            dimension_semantics=("parallel",),   # shards cell tiles across TCs (v7x)
        ),
    )(alpha_arr, zc, wc, drug_n)

    return out_padded[:n_cell, :n_drug].astype(jnp.float32)


def _reference(encode_output, w_cell, w_drug, n_cell, n_drug, alpha):
    z_cell = encode_output[:n_cell]
    z_drug = encode_output[n_cell:n_cell + n_drug]
    cell = z_cell @ w_cell.T
    drug = z_drug @ w_drug.T
    cc = cell - cell.mean(axis=1, keepdims=True)
    dc = drug - drug.mean(axis=1, keepdims=True)
    num = cc @ dc.T
    den = jnp.sqrt((cc * cc).sum(1, keepdims=True)
                   * (dc * dc).sum(1, keepdims=True).T)
    return jax.nn.sigmoid(alpha * num / den)


if __name__ == "__main__":
    # Small shapes consistent with the module (deliberately unaligned to
    # exercise padding / full-dim-block paths).
    n_cell, n_drug = 200, 72
    n_hid1, n_hid2 = 100, 48
    alpha = 5.74

    key = jax.random.PRNGKey(0)
    k1, k2, k3 = jax.random.split(key, 3)
    encode_output = jax.random.normal(k1, (n_cell + n_drug, n_hid1), jnp.float32)
    w_cell = jax.random.normal(k2, (n_hid2, n_hid1), jnp.float32) * 0.1
    w_drug = jax.random.normal(k3, (n_hid2, n_hid1), jnp.float32) * 0.1

    out = gdecoder_forward(encode_output, w_cell, w_drug, n_cell, n_drug, alpha)
    out = jax.block_until_ready(out)

    ref = _reference(encode_output, w_cell, w_drug, n_cell, n_drug, alpha)
    assert out.shape == (n_cell, n_drug)
    # bf16 MXU operands + bf16 output -> loosened tolerance vs f32 reference.
    max_err = float(jnp.max(jnp.abs(out - ref)))
    assert max_err < 5e-2, f"max abs error {max_err} vs f32 reference"

    print("KERNEL_OK")
</pallas_src>

<mosaic_0001>
module attributes {stable_mosaic.version = 11 : i64} {
  func.func @_drug_prep_kernel(%arg0: memref<128x100xbf16, #tpu.memory_space<vmem>>, %arg1: memref<48x100xbf16, #tpu.memory_space<vmem>>, %arg2: memref<128x48xbf16, #tpu.memory_space<vmem>>) attributes {dimension_semantics = [], scalar_prefetch = 0 : i64, scratch_operands = 0 : i64, tpu.core_type = #tpu.core_type<tc>} {
    %c0 = arith.constant 0 : index
    %c0_0 = arith.constant 0 : index
    %0 = vector.load %arg0[%c0, %c0_0] : memref<128x100xbf16, #tpu.memory_space<vmem>>, vector<128x100xbf16>
    %c0_1 = arith.constant 0 : index
    %c0_2 = arith.constant 0 : index
    %1 = vector.load %arg1[%c0_1, %c0_2] : memref<48x100xbf16, #tpu.memory_space<vmem>>, vector<48x100xbf16>
    %cst = arith.constant dense<0.000000e+00> : vector<128x48xf32>
    %2 = tpu.matmul %0, %1, %cst {dimension_numbers = #tpu.dot_dimension_numbers<[1], [1], [0], [0], [0, 0, 1, 0], [], []>} : vector<128x100xbf16>, vector<48x100xbf16>, vector<128x48xf32> -> vector<128x48xf32>
    %cst_3 = arith.constant dense<0.000000e+00> : vector<128xf32>
    %3 = vector.multi_reduction <add>, %2, %cst_3 [1] : vector<128x48xf32> to vector<128xf32>
    %4 = vector.shape_cast %3 : vector<128xf32> to vector<128x1xf32>
    %cst_4 = arith.constant 4.800000e+01 : f32
    %5 = vector.broadcast %cst_4 : f32 to vector<128x1xf32>
    %6 = arith.divf %4, %5 : vector<128x1xf32>
    %7 = vector.broadcast %6 : vector<128x1xf32> to vector<128x48xf32>
    %8 = arith.subf %2, %7 : vector<128x48xf32>
    %9 = arith.mulf %8, %8 : vector<128x48xf32>
    %cst_5 = arith.constant dense<0.000000e+00> : vector<128xf32>
    %10 = vector.multi_reduction <add>, %9, %cst_5 [1] : vector<128x48xf32> to vector<128xf32>
    %11 = vector.shape_cast %10 : vector<128xf32> to vector<128x1xf32>
    %cst_6 = arith.constant 9.99999996E-13 : f32
    %12 = vector.broadcast %cst_6 : f32 to vector<128x1xf32>
    %13 = arith.addf %11, %12 : vector<128x1xf32>
    %14 = math.rsqrt %13 : vector<128x1xf32>
    %15 = vector.broadcast %14 : vector<128x1xf32> to vector<128x48xf32>
    %16 = arith.mulf %8, %15 : vector<128x48xf32>
    %17 = arith.truncf %16 : vector<128x48xf32> to vector<128x48xbf16>
    %c0_7 = arith.constant 0 : index
    %c0_8 = arith.constant 0 : index
    %18 = vector.load %arg2[%c0_7, %c0_8] : memref<128x48xbf16, #tpu.memory_space<vmem>>, vector<128x48xbf16>
    tpu.vector_store %arg2[%c0_7, %c0_8], %17 {strides = array<i32>} : memref<128x48xbf16, #tpu.memory_space<vmem>>, vector<128x48xbf16>,
    return
  }
}

</mosaic_0001>

<bundles_post_ra>
// kernel: tpu_custom_call.1
= control target key start
LH: loop header
LB: loop body
LE: loop exit
PB: predicated region body
PF: predicated region fallthrough
CT: control target
= control target key end

     0   :  { %vm89_vm0 = vcmask 818176   ;;  %vm172_vm1 = vcmask 392192   ;;  %v660_v46 = vmov 48.0   ;;  %vm532_vm9 = vcmask 388096   ;;  %s1036_s1 = inlined_call_operand.vmem [shape: bf16[48,100], index: 1, kind: input, shape index: {}]   ;;  %s1037_s0 = inlined_call_operand.vmem [shape: bf16[128,100], index: 0, kind: input, shape index: {}]   ;;  %s1038_s2 = inlined_call_operand.vmem [shape: bf16[128,48], index: 2, kind: output, shape index: {}]  }
   0x1   :  { %v615_v0 = vld [vmem:[%s1036_s1 + $0x10] sm:$0xff]  ;;  %v614_v2 = vld [vmem:[%s1036_s1 + $0x8] sm:$0xff]  ;;  %v613_v4 = vld [vmem:[%s1036_s1] sm:$0xff]  ;;  %626 = vrcp.f32 %v660_v46 }
   0x2   :  { %v121_v1 = vsel %vm89_vm0, %v615_v0, 0  ;;  %v118_v3 = vsel %vm89_vm0, %v614_v2, 0  ;;  %v115_v5 = vsel %vm89_vm0, %v613_v4, 0  ;;  %v605_v6 = vld [vmem:[%s1037_s0] sm:$0xff]  ;;  %v607_v7 = vld [vmem:[%s1037_s0 + $0x10] sm:$0xff]  ;;  %v606_v10 = vld [vmem:[%s1037_s0 + $0x8] sm:$0xff] }
   0x3   :  { %128 = vmatpush.bf16.xpose.msra.mxu0 %v121_v1  ;;  %616 = vmatpush.bf16.xpose.msra.mxu1 %v121_v1  ;;  %v609_v8 = vld [vmem:[%s1037_s0 + $0x20] sm:$0xff]  ;;  %v611_v9 = vld [vmem:[%s1037_s0 + $0x30] sm:$0xff]  ;;  %v608_v11 = vld [vmem:[%s1037_s0 + $0x18] sm:$0xff] }
   0x4   :  { %617 = vmatpush.bf16.xpose.msra.mxu2 %v121_v1  ;;  %618 = vmatpush.bf16.xpose.msra.mxu3 %v121_v1  ;;  %v610_v12 = vld [vmem:[%s1037_s0 + $0x28] sm:$0xff]  ;;  %v612_v13 = vld [vmem:[%s1037_s0 + $0x38] sm:$0xff] }
   0x7   :  { %v627_v47 = vpop.eup %626 }
   0x8   :  { %v222_v48 = vmul.f32 48.0, %v627_v47  ;;  %vm226_vm2 = vweird.f32 %v627_v47 }
   0xa   :  { %v223_v49 = vsub.f32 1.0, %v222_v48 }
   0xb   :  { %129 = vmatpush.bf16.xpose.msra.mxu0 %v118_v3  ;;  %619 = vmatpush.bf16.xpose.msra.mxu1 %v118_v3 }
   0xc   :  { %620 = vmatpush.bf16.xpose.msra.mxu2 %v118_v3  ;;  %621 = vmatpush.bf16.xpose.msra.mxu3 %v118_v3  ;;  %v224_v50 = vmul.f32 %v627_v47, %v223_v49 }
   0xe   :  { %v225_v51 = vadd.f32 %v627_v47, %v224_v50 }
  0x10   :  { %v778_v52 = vsel %vm226_vm2, %v627_v47, %v225_v51 }
  0x13   :  { %130 = vmatpush.bf16.xpose.msra.mxu0 %v115_v5  ;;  %622 = vmatpush.bf16.xpose.msra.mxu1 %v115_v5 }
  0x14   :  { %623 = vmatpush.bf16.xpose.msra.mxu2 %v115_v5  ;;  %624 = vmatpush.bf16.xpose.msra.mxu3 %v115_v5 }
  0x1a   :  { %597 = vmatmul.msk.bf16.vlgmr.msra.gmra.mxu0 %vm89_vm0, %v605_v6  ;;  %599 = vmatmul.msk.bf16.vlgmr.msra.gmra.mxu1 %vm89_vm0, %v607_v7 }
  0x1b   :  { %601 = vmatmul.msk.bf16.vlgmr.msra.gmra.mxu2 %vm89_vm0, %v609_v8  ;;  %603 = vmatmul.msk.bf16.vlgmr.msra.gmra.mxu3 %vm89_vm0, %v611_v9 }
  0x2a   :  { %598 = vmatmul.msk.bf16.gmra.mxu0 %vm89_vm0, %v606_v10  ;;  %600 = vmatmul.msk.bf16.gmra.mxu1 %vm89_vm0, %v608_v11 }
  0x2b   :  { %602 = vmatmul.msk.bf16.gmra.mxu2 %vm89_vm0, %v610_v12  ;;  %604 = vmatmul.msk.bf16.gmra.mxu3 %vm89_vm0, %v612_v13 }
  0x97   :  { %v132_v14 = vpop.f32.mrf.mxu0  ;;  %v142_v15 = vpop.f32.mrf.mxu1 }
  0x98   :  { %v185_v16 = vsel %vm172_vm1, %v142_v15, 0.0  ;;  %v173_v17 = vsel %vm172_vm1, %v132_v14, 0.0 }
  0x99   :  { %186 = vadd.xlane.f32.xlu2 %v185_v16  ;;  %174 = vadd.xlane.f32.xlu0 %v173_v17 }
  0x9e   :  { %v722_v18 = vpop.f32.mrf.mxu2  ;;  %v724_v19 = vpop.f32.mrf.mxu3 }
  0x9f   :  { %v197_v20 = vsel %vm172_vm1, %v722_v18, 0.0  ;;  %v209_v21 = vsel %vm172_vm1, %v724_v19, 0.0  ;;  %v730_v22 = vpop.f32.mrf.mxu0  ;;  %v732_v23 = vpop.f32.mrf.mxu1 }
  0xa0   :  { %v188_v27 = vsel %vm172_vm1, %v732_v23, 0.0  ;;  %v176_v28 = vsel %vm172_vm1, %v730_v22, 0.0 }
  0xa1   :  { %198 = vadd.xlane.f32.xlu2 %v197_v20  ;;  %210 = vadd.xlane.f32.xlu0 %v209_v21 }
  0xa6   :  { %v734_v24 = vpop.f32.mrf.mxu2  ;;  %v736_v25 = vpop.f32.mrf.mxu3 }
  0xa7   :  { %v212_v26 = vsel %vm172_vm1, %v736_v25, 0.0  ;;  %v744_v29 = vpop.f32.mrf.mxu0  ;;  %v200_v32 = vsel %vm172_vm1, %v734_v24, 0.0  ;;  %v754_v34 = vpop.f32.mrf.mxu1 }
  0xa8   :  { %213 = vadd.xlane.f32.xlu1 %v212_v26  ;;  %v179_v30 = vsel %vm172_vm1, %v744_v29, 0.0  ;;  %v191_v37 = vsel %vm172_vm1, %v754_v34, 0.0 }
  0xa9   :  { %189 = vadd.xlane.f32.xlu2 %v188_v27  ;;  %177 = vadd.xlane.f32.xlu0 %v176_v28 }
  0xae   :  { %v748_v31 = vpop.f32.mrf.mxu2  ;;  %v752_v33 = vpop.f32.mrf.mxu3 }
  0xaf   :  { %v203_v35 = vsel %vm172_vm1, %v748_v31, 0.0  ;;  %v766_v40 = vpop.f32.mrf.mxu0  ;;  %v215_v41 = vsel %vm172_vm1, %v752_v33, 0.0  ;;  %v774_v44 = vpop.f32.mrf.mxu1 }
  0xb0   :  { %180 = vadd.xlane.f32.xlu1 %v179_v30  ;;  %v182_v43 = vsel %vm172_vm1, %v766_v40, 0.0  ;;  %v194_v45 = vsel %vm172_vm1, %v774_v44, 0.0 }
  0xb1   :  { %201 = vadd.xlane.f32.xlu0 %v200_v32 }
  0xb6   :  { %v758_v36 = vpop.f32.mrf.mxu2  ;;  %v764_v39 = vpop.f32.mrf.mxu3 }
  0xb7   :  { %v206_v38 = vsel %vm172_vm1, %v758_v36, 0.0  ;;  %v218_v42 = vsel %vm172_vm1, %v764_v39, 0.0 }
  0xb8   :  { %207 = vadd.xlane.f32.xlu2 %v206_v38  ;;  %204 = vadd.xlane.f32.xlu1 %v203_v35 }
  0xb9   :  { %192 = vadd.xlane.f32.xlu0 %v191_v37 }
  0xc0   :  { %216 = vadd.xlane.f32.xlu2 %v215_v41  ;;  %183 = vadd.xlane.f32.xlu1 %v182_v43 }
  0xc1   :  { %219 = vadd.xlane.f32.xlu0 %v218_v42 }
  0xc8   :  { %195 = vadd.xlane.f32.xlu1 %v194_v45 }
 0x10c   :  { %v187_v53 = vpop.xlane.xlu2 %186  ;;  %v175_v54 = vpop.xlane.xlu0 %174 }
 0x10d   :  { %v232_v55 = vmul.f32 %v778_v52, %v187_v53  ;;  %v228_v56 = vmul.f32 %v778_v52, %v175_v54 }
 0x10f   :  { %v782_v57 = vsub.f32 %v142_v15, %v232_v55  ;;  %v784_v58 = vsub.f32 %v132_v14, %v228_v56 }
 0x111   :  { %v264_v59 = vmul.f32 %v782_v57, %v782_v57  ;;  %v260_v60 = vmul.f32 %v784_v58, %v784_v58 }
 0x113   :  { %v288_v61 = vsel %vm172_vm1, %v264_v59, 0.0  ;;  %v276_v62 = vsel %vm172_vm1, %v260_v60, 0.0 }
 0x114   :  { %v199_v63 = vpop.xlane.xlu2 %198  ;;  %289 = vadd.xlane.f32.xlu2 %v288_v61  ;;  %v211_v0 = vpop.xlane.xlu0 %210  ;;  %277 = vadd.xlane.f32.xlu1 %v276_v62 }
 0x115   :  { %v236_v1 = vmul.f32 %v778_v52, %v199_v63  ;;  %v240_v2 = vmul.f32 %v778_v52, %v211_v0 }
 0x117   :  { %v795_v3 = vsub.f32 %v722_v18, %v236_v1  ;;  %v798_v4 = vsub.f32 %v724_v19, %v240_v2 }
 0x119   :  { %v268_v5 = vmul.f32 %v795_v3, %v795_v3  ;;  %v272_v6 = vmul.f32 %v798_v4, %v798_v4 }
 0x11b   :  { %v804_v7 = vpop.xlane.xlu1 %213  ;;  %v300_v8 = vsel %vm172_vm1, %v268_v5, 0.0  ;;  %v312_v9 = vsel %vm172_vm1, %v272_v6, 0.0 }
 0x11c   :  { %v190_v10 = vpop.xlane.xlu2 %189  ;;  %301 = vadd.xlane.f32.xlu0 %v300_v8  ;;  %v178_v11 = vpop.xlane.xlu0 %177  ;;  %313 = vadd.xlane.f32.xlu1 %v312_v9 }
 0x11d   :  { %v233_v12 = vmul.f32 %v778_v52, %v190_v10  ;;  %v229_v13 = vmul.f32 %v778_v52, %v178_v11 }
 0x11f   :  { %v811_v14 = vsub.f32 %v732_v23, %v233_v12  ;;  %v814_v15 = vsub.f32 %v730_v22, %v229_v13 }
 0x121   :  { %v265_v16 = vmul.f32 %v811_v14, %v811_v14  ;;  %v261_v17 = vmul.f32 %v814_v15, %v814_v15 }
 0x123   :  { %v181_v18 = vpop.xlane.xlu1 %180  ;;  %v291_v19 = vsel %vm172_vm1, %v265_v16, 0.0  ;;  %v279_v20 = vsel %vm172_vm1, %v261_v17, 0.0 }
 0x124   :  { %v230_v21 = vmul.f32 %v778_v52, %v181_v18  ;;  %292 = vadd.xlane.f32.xlu0 %v291_v19  ;;  %280 = vadd.xlane.f32.xlu2 %v279_v20  ;;  %v202_v23 = vpop.xlane.xlu0 %201 }
 0x125   :  { %v237_v26 = vmul.f32 %v778_v52, %v202_v23 }
 0x126   :  { %v825_v22 = vsub.f32 %v744_v29, %v230_v21 }
 0x127   :  { %v828_v27 = vsub.f32 %v734_v24, %v237_v26 }
 0x128   :  { %v262_v28 = vmul.f32 %v825_v22, %v825_v22 }
 0x129   :  { %v269_v30 = vmul.f32 %v828_v27, %v828_v27 }
 0x12a   :  { %v282_v37 = vsel %vm172_vm1, %v262_v28, 0.0 }
 0x12b   :  { %v208_v32 = vpop.xlane.xlu2 %207  ;;  %v205_v35 = vpop.xlane.xlu1 %204  ;;  %v303_v38 = vsel %vm172_vm1, %v269_v30, 0.0 }
 0x12c   :  { %v239_v41 = vmul.f32 %v778_v52, %v208_v32  ;;  %v238_v29 = vmul.f32 %v778_v52, %v205_v35  ;;  %v193_v42 = vpop.xlane.xlu0 %192  ;;  %283 = vadd.xlane.f32.xlu0 %v282_v37  ;;  %304 = vadd.xlane.f32.xlu1 %v303_v38 }
 0x12d   :  { %v234_v24 = vmul.f32 %v778_v52, %v193_v42 }
 0x12e   :  { %v840_v43 = vsub.f32 %v758_v36, %v239_v41  ;;  %v843_v45 = vsub.f32 %v748_v31, %v238_v29 }
 0x12f   :  { %v846_v46 = vsub.f32 %v754_v34, %v234_v24 }
 0x130   :  { %v270_v47 = vmul.f32 %v843_v45, %v843_v45  ;;  %v271_v48 = vmul.f32 %v840_v43, %v840_v43 }
 0x131   :  { %v266_v49 = vmul.f32 %v846_v46, %v846_v46 }
 0x132   :  { %v306_v50 = vsel %vm172_vm1, %v270_v47, 0.0  ;;  %v309_v31 = vsel %vm172_vm1, %v271_v48, 0.0 }
 0x133   :  { %v217_v51 = vpop.xlane.xlu2 %216  ;;  %307 = vadd.xlane.f32.xlu2 %v306_v50  ;;  %v184_v36 = vpop.xlane.xlu1 %183  ;;  %v294_v53 = vsel %vm172_vm1, %v266_v49, 0.0 }
 0x134   :  { %v242_v34 = vmul.f32 %v778_v52, %v217_v51  ;;  %v231_v54 = vmul.f32 %v778_v52, %v184_v36  ;;  %v220_v55 = vpop.xlane.xlu0 %219  ;;  %310 = vadd.xlane.f32.xlu0 %v309_v31  ;;  %295 = vadd.xlane.f32.xlu1 %v294_v53 }
 0x135   :  { %v243_v60 = vmul.f32 %v778_v52, %v220_v55 }
 0x136   :  { %v860_v56 = vsub.f32 %v752_v33, %v242_v34  ;;  %v863_v59 = vsub.f32 %v766_v40, %v231_v54  ;;  %v241_v40 = vmul.f32 %v778_v52, %v804_v7 }
 0x137   :  { %v871_v63 = vsub.f32 %v764_v39, %v243_v60 }
 0x138   :  { %v274_v61 = vmul.f32 %v860_v56, %v860_v56  ;;  %v263_v62 = vmul.f32 %v863_v59, %v863_v59  ;;  %v886_v8 = vsub.f32 %v736_v25, %v241_v40 }
 0x139   :  { %v275_v6 = vmul.f32 %v871_v63, %v871_v63 }
 0x13a   :  { %v318_v1 = vsel %vm172_vm1, %v274_v61, 0.0  ;;  %v285_v33 = vsel %vm172_vm1, %v263_v62, 0.0 }
 0x13b   :  { %v196_v0 = vpop.xlane.xlu1 %195  ;;  %v321_v10 = vsel %vm172_vm1, %v275_v6, 0.0 }
 0x13c   :  { %v235_v2 = vmul.f32 %v778_v52, %v196_v0  ;;  %319 = vadd.xlane.f32.xlu0 %v318_v1  ;;  %286 = vadd.xlane.f32.xlu1 %v285_v33  ;;  %v273_v52 = vmul.f32 %v886_v8, %v886_v8 }
 0x13e   :  { %v879_v5 = vsub.f32 %v774_v44, %v235_v2  ;;  %v315_v44 = vsel %vm172_vm1, %v273_v52, 0.0 }
 0x140   :  { %v267_v39 = vmul.f32 %v879_v5, %v879_v5 }
 0x142   :  { %v297_v9 = vsel %vm172_vm1, %v267_v39, 0.0 }
 0x143   :  { %298 = vadd.xlane.f32.xlu2 %v297_v9 }
 0x144   :  { %322 = vadd.xlane.f32.xlu1 %v321_v10 }
 0x14b   :  { %316 = vadd.xlane.f32.xlu2 %v315_v44 }
 0x187   :  { %v290_v7 = vpop.xlane.xlu2 %289  ;;  %v278_v11 = vpop.xlane.xlu1 %277 }
 0x188   :  { %v328_v12 = vadd.f32 1e-12, %v290_v7  ;;  %v324_v13 = vadd.f32 1e-12, %v278_v11 }
 0x18a   :  { %628 = vrsqrt.f32 %v328_v12  ;;  %vm386_vm5 = vweird.f32 %v328_v12  ;;  %vm346_vm7 = vweird.f32 %v324_v13 }
 0x18b   :  { %630 = vrsqrt.f32 %v324_v13 }
 0x18f   :  { %v302_v25 = vpop.xlane.xlu0 %301  ;;  %v314_v16 = vpop.xlane.xlu1 %313 }
 0x190   :  { %v629_v17 = vpop.eup %628  ;;  %v332_v18 = vadd.f32 1e-12, %v302_v25  ;;  %v893_v19 = vadd.f32 1e-12, %v314_v16 }
 0x191   :  { %v631_v20 = vpop.eup %630  ;;  %v381_v21 = vmul.f32 %v629_v17, %v328_v12  ;;  %vm387_vm3 = vweird.f32 %v629_v17 }
 0x192   :  { %v341_v23 = vmul.f32 %v631_v20, %v324_v13  ;;  %632 = vrsqrt.f32 %v332_v18  ;;  %vm347_vm4 = vweird.f32 %v631_v20  ;;  %vm388_vm6 = vmor %vm386_vm5, %vm387_vm3  ;;  %vm426_vm12 = vweird.f32 %v332_v18 }
 0x193   :  { %v382_v26 = vmul.f32 %v629_v17, %v381_v21  ;;  %634 = vrsqrt.f32 %v893_v19  ;;  %vm348_vm8 = vmor %vm346_vm7, %vm347_vm4  ;;  %vm466_vm14 = vweird.f32 %v893_v19 }
 0x194   :  { %v342_v28 = vmul.f32 %v631_v20, %v341_v23 }
 0x195   :  { %v383_v30 = vmul.f32 0.5, %v382_v26 }
 0x196   :  { %v343_v32 = vmul.f32 0.5, %v342_v28 }
 0x197   :  { %v384_v35 = vsub.f32 1.5, %v383_v30  ;;  %v281_v37 = vpop.xlane.xlu2 %280  ;;  %v293_v38 = vpop.xlane.xlu0 %292 }
 0x198   :  { %v633_v41 = vpop.eup %632  ;;  %v344_v29 = vsub.f32 1.5, %v343_v32  ;;  %v896_v42 = vadd.f32 1e-12, %v281_v37  ;;  %v898_v24 = vadd.f32 1e-12, %v293_v38 }
 0x199   :  { %v635_v47 = vpop.eup %634  ;;  %v385_v48 = vmul.f32 %v629_v17, %v384_v35  ;;  %v421_v49 = vmul.f32 %v633_v41, %v332_v18  ;;  %vm427_vm10 = vweird.f32 %v633_v41 }
 0x19a   :  { %v345_v50 = vmul.f32 %v631_v20, %v344_v29  ;;  %v461_v51 = vmul.f32 %v635_v47, %v893_v19  ;;  %636 = vrsqrt.f32 %v896_v42  ;;  %vm467_vm11 = vweird.f32 %v635_v47  ;;  %vm428_vm13 = vmor %vm426_vm12, %vm427_vm10 }
 0x19b   :  { %v389_v36 = vsel %vm388_vm6, %v629_v17, %v385_v48  ;;  %v422_v31 = vmul.f32 %v633_v41, %v421_v49  ;;  %638 = vrsqrt.f32 %v898_v24  ;;  %vm468_vm15 = vmor %vm466_vm14, %vm467_vm11  ;;  %vm356_vm2 = vweird.f32 %v896_v42 }
 0x19c   :  { %v504_v53 = vmul.f32 %v389_v36, %v782_v57  ;;  %v349_v34 = vsel %vm348_vm8, %v631_v20, %v345_v50  ;;  %v462_v54 = vmul.f32 %v635_v47, %v461_v51  ;;  %vm396_vm4 = vweird.f32 %v898_v24 }
 0x19d   :  { %v500_v55 = vmul.f32 %v349_v34, %v784_v58  ;;  %v423_v60 = vmul.f32 0.5, %v422_v31 }
 0x19e   :  { %v520_v61 = vpack.c.bf16 %v504_v53, %v504_v53  ;;  %v463_v62 = vmul.f32 0.5, %v462_v54 }
 0x19f   :  { %v516_v0 = vpack.c.bf16 %v500_v55, %v500_v55  ;;  %v424_v1 = vsub.f32 1.5, %v423_v60  ;;  %v284_v33 = vpop.xlane.xlu0 %283  ;;  %v305_v2 = vpop.xlane.xlu1 %304 }
 0x1a0   :  { %v637_v40 = vpop.eup %636  ;;  %537 = vst.msk [vmem:[%s1038_s2 + $0x10] sm:$0xf] %vm532_vm9, %v520_v61  ;;  %v464_v57 = vsub.f32 1.5, %v463_v62  ;;  %v909_v6 = vadd.f32 1e-12, %v284_v33 }
 0x1a1   :  { %v639_v39 = vpop.eup %638  ;;  %533 = vst.msk [vmem:[%s1038_s2] sm:$0xf] %vm532_vm9, %v516_v0  ;;  %v425_v58 = vmul.f32 %v633_v41, %v424_v1  ;;  %v351_v9 = vmul.f32 %v637_v40, %v896_v42  ;;  %v916_v10 = vadd.f32 1e-12, %v305_v2  ;;  %vm357_vm0 = vweird.f32 %v637_v40 }
 0x1a2   :  { %v465_v52 = vmul.f32 %v635_v47, %v464_v57  ;;  %v391_v44 = vmul.f32 %v639_v39, %v898_v24  ;;  %640 = vrsqrt.f32 %v909_v6  ;;  %vm397_vm1 = vweird.f32 %v639_v39  ;;  %vm358_vm3 = vmor %vm356_vm2, %vm357_vm0 }
 0x1a3   :  { %v429_v7 = vsel %vm428_vm13, %v633_v41, %v425_v58  ;;  %v352_v11 = vmul.f32 %v637_v40, %v351_v9  ;;  %642 = vrsqrt.f32 %v916_v10  ;;  %vm398_vm5 = vmor %vm396_vm4, %vm397_vm1  ;;  %vm366_vm8 = vweird.f32 %v909_v6 }
 0x1a4   :  { %v508_v12 = vmul.f32 %v429_v7, %v795_v3  ;;  %v469_v13 = vsel %vm468_vm15, %v635_v47, %v465_v52  ;;  %v392_v25 = vmul.f32 %v639_v39, %v391_v44  ;;  %vm436_vm11 = vweird.f32 %v916_v10 }
 0x1a5   :  { %v512_v16 = vmul.f32 %v469_v13, %v798_v4  ;;  %v353_v17 = vmul.f32 0.5, %v352_v11 }
 0x1a6   :  { %v524_v18 = vpack.c.bf16 %v508_v12, %v508_v12  ;;  %v393_v20 = vmul.f32 0.5, %v392_v25  ;;  %v308_v21 = vpop.xlane.xlu2 %307 }
 0x1a7   :  { %v528_v19 = vpack.c.bf16 %v512_v16, %v512_v16  ;;  %v354_v23 = vsub.f32 1.5, %v353_v17  ;;  %v924_v26 = vadd.f32 1e-12, %v308_v21  ;;  %v311_v28 = vpop.xlane.xlu0 %310  ;;  %v296_v30 = vpop.xlane.xlu1 %295 }
 0x1a8   :  { %v641_v32 = vpop.eup %640  ;;  %541 = vst.msk [vmem:[%s1038_s2 + $0x20] sm:$0xf] %vm532_vm9, %v524_v18  ;;  %v394_v3 = vsub.f32 1.5, %v393_v20  ;;  %v930_v4 = vadd.f32 1e-12, %v311_v28 }
 0x1a9   :  { %v643_v35 = vpop.eup %642  ;;  %545 = vst.msk [vmem:[%s1038_s2 + $0x30] sm:$0xf] %vm532_vm9, %v528_v19  ;;  %v355_v37 = vmul.f32 %v637_v40, %v354_v23  ;;  %v361_v38 = vmul.f32 %v641_v32, %v909_v6  ;;  %644 = vrsqrt.f32 %v924_v26  ;;  %v944_v51 = vadd.f32 1e-12, %v296_v30 }
 0x1aa   :  { %v395_v41 = vmul.f32 %v639_v39, %v394_v3  ;;  %v431_v29 = vmul.f32 %v643_v35, %v916_v10  ;;  %646 = vrsqrt.f32 %v930_v4  ;;  %vm367_vm6 = vweird.f32 %v641_v32 }
 0x1ab   :  { %v359_v47 = vsel %vm358_vm3, %v637_v40, %v355_v37  ;;  %v362_v48 = vmul.f32 %v641_v32, %v361_v38  ;;  %648 = vrsqrt.f32 %v944_v51  ;;  %vm437_vm7 = vweird.f32 %v643_v35  ;;  %vm368_vm10 = vmor %vm366_vm8, %vm367_vm6 }
 0x1ac   :  { %v501_v49 = vmul.f32 %v359_v47, %v814_v15  ;;  %v399_v50 = vsel %vm398_vm5, %v639_v39, %v395_v41  ;;  %v432_v42 = vmul.f32 %v643_v35, %v431_v29  ;;  %vm438_vm12 = vmor %vm436_vm11, %vm437_vm7  ;;  %vm446_vm14 = vweird.f32 %v924_v26 }
 0x1ad   :  { %v505_v36 = vmul.f32 %v399_v50, %v811_v14  ;;  %v363_v31 = vmul.f32 0.5, %v362_v48  ;;  %vm456_vm1 = vweird.f32 %v930_v4  ;;  %vm406_vm4 = vweird.f32 %v944_v51 }
 0x1ae   :  { %v517_v53 = vpack.c.bf16 %v501_v49, %v501_v49  ;;  %v433_v34 = vmul.f32 0.5, %v432_v42 }
 0x1af   :  { %v645_v24 = vpop.eup %644  ;;  %v521_v54 = vpack.c.bf16 %v505_v36, %v505_v36  ;;  %v364_v55 = vsub.f32 1.5, %v363_v31  ;;  %v320_v60 = vpop.xlane.xlu0 %319 }
 0x1b0   :  { %v287_v61 = vpop.xlane.xlu1 %286  ;;  %534 = vst.msk [vmem:[%s1038_s2 + $0x4] sm:$0xf] %vm532_vm9, %v517_v53  ;;  %v434_v15 = vsub.f32 1.5, %v433_v34  ;;  %v441_v14 = vmul.f32 %v645_v24, %v924_v26  ;;  %v953_v62 = vadd.f32 1e-12, %v320_v60  ;;  %v647_v0 = vpop.eup %646  ;;  %vm447_vm13 = vweird.f32 %v645_v24 }
 0x1b1   :  { %538 = vst.msk [vmem:[%s1038_s2 + $0x14] sm:$0xf] %vm532_vm9, %v521_v54  ;;  %v365_v1 = vmul.f32 %v641_v32, %v364_v55  ;;  %v960_v33 = vadd.f32 1e-12, %v287_v61  ;;  %v451_v57 = vmul.f32 %v647_v0, %v930_v4  ;;  %v649_v58 = vpop.eup %648  ;;  %vm457_vm15 = vweird.f32 %v647_v0  ;;  %vm448_vm0 = vmor %vm446_vm14, %vm447_vm13 }
 0x1b2   :  { %v435_v2 = vmul.f32 %v643_v35, %v434_v15  ;;  %v442_v40 = vmul.f32 %v645_v24, %v441_v14  ;;  %650 = vrsqrt.f32 %v953_v62  ;;  %v401_v11 = vmul.f32 %v649_v58, %v944_v51  ;;  %vm458_vm2 = vmor %vm456_vm1, %vm457_vm15 }
 0x1b3   :  { %v369_v39 = vsel %vm368_vm10, %v641_v32, %v365_v1  ;;  %v452_v7 = vmul.f32 %v647_v0, %v451_v57  ;;  %652 = vrsqrt.f32 %v960_v33  ;;  %vm407_vm3 = vweird.f32 %v649_v58 }
 0x1b4   :  { %v502_v9 = vmul.f32 %v369_v39, %v825_v22  ;;  %v439_v52 = vsel %vm438_vm12, %v643_v35, %v435_v2  ;;  %v443_v44 = vmul.f32 0.5, %v442_v40  ;;  %v402_v17 = vmul.f32 %v649_v58, %v401_v11  ;;  %vm408_vm5 = vmor %vm406_vm4, %vm407_vm3 }
 0x1b5   :  { %v509_v6 = vmul.f32 %v439_v52, %v828_v27  ;;  %v453_v13 = vmul.f32 0.5, %v452_v7  ;;  %vm486_vm7 = vweird.f32 %v953_v62  ;;  %vm376_vm11 = vweird.f32 %v960_v33 }
 0x1b6   :  { %v518_v10 = vpack.c.bf16 %v502_v9, %v502_v9  ;;  %v444_v12 = vsub.f32 1.5, %v443_v44  ;;  %v299_v25 = vpop.xlane.xlu2 %298  ;;  %v403_v23 = vmul.f32 0.5, %v402_v17 }
 0x1b7   :  { %v525_v16 = vpack.c.bf16 %v509_v6, %v509_v6  ;;  %v970_v18 = vadd.f32 1e-12, %v299_v25  ;;  %v454_v20 = vsub.f32 1.5, %v453_v13 }
 0x1b8   :  { %v323_v22 = vpop.xlane.xlu1 %322  ;;  %535 = vst.msk [vmem:[%s1038_s2 + $0x8] sm:$0xf] %vm532_vm9, %v518_v10  ;;  %v445_v27 = vmul.f32 %v645_v24, %v444_v12  ;;  %v651_v19 = vpop.eup %650  ;;  %v404_v35 = vsub.f32 1.5, %v403_v23 }
 0x1b9   :  { %v976_v21 = vadd.f32 1e-12, %v323_v22  ;;  %542 = vst.msk [vmem:[%s1038_s2 + $0x24] sm:$0xf] %vm532_vm9, %v525_v16  ;;  %654 = vrsqrt.f32 %v970_v18  ;;  %v455_v28 = vmul.f32 %v647_v0, %v454_v20  ;;  %v481_v30 = vmul.f32 %v651_v19, %v953_v62  ;;  %v653_v32 = vpop.eup %652 }
 0x1ba   :  { %v449_v26 = vsel %vm448_vm0, %v645_v24, %v445_v27  ;;  %v371_v41 = vmul.f32 %v653_v32, %v960_v33  ;;  %v405_v48 = vmul.f32 %v649_v58, %v404_v35  ;;  %vm487_vm6 = vweird.f32 %v651_v19 }
 0x1bb   :  { %v510_v3 = vmul.f32 %v449_v26, %v843_v45  ;;  %656 = vrsqrt.f32 %v976_v21  ;;  %v459_v37 = vsel %vm458_vm2, %v647_v0, %v455_v28  ;;  %v482_v38 = vmul.f32 %v651_v19, %v481_v30  ;;  %vm488_vm10 = vmor %vm486_vm7, %vm487_vm6 }
 0x1bc   :  { %v511_v47 = vmul.f32 %v459_v37, %v840_v43  ;;  %v372_v49 = vmul.f32 %v653_v32, %v371_v41  ;;  %v409_v36 = vsel %vm408_vm5, %v649_v58, %v405_v48  ;;  %vm377_vm8 = vweird.f32 %v653_v32 }
 0x1bd   :  { %v526_v29 = vpack.c.bf16 %v510_v3, %v510_v3  ;;  %v483_v4 = vmul.f32 0.5, %v482_v38  ;;  %v506_v53 = vmul.f32 %v409_v36, %v846_v46  ;;  %vm378_vm12 = vmor %vm376_vm11, %vm377_vm8  ;;  %vm416_vm14 = vweird.f32 %v970_v18 }
 0x1be   :  { %v317_v50 = vpop.xlane.xlu2 %316  ;;  %v527_v42 = vpack.c.bf16 %v511_v47, %v511_v47  ;;  %v373_v34 = vmul.f32 0.5, %v372_v49  ;;  %vm496_vm1 = vweird.f32 %v976_v21 }
 0x1bf   :  { %v655_v45 = vpop.eup %654  ;;  %543 = vst.msk [vmem:[%s1038_s2 + $0x28] sm:$0xf] %vm532_vm9, %v526_v29  ;;  %v337_v31 = vadd.f32 1e-12, %v317_v50  ;;  %v484_v43 = vsub.f32 1.5, %v483_v4  ;;  %v522_v54 = vpack.c.bf16 %v506_v53, %v506_v53 }
 0x1c0   :  { %v411_v51 = vmul.f32 %v655_v45, %v970_v18  ;;  %544 = vst.msk [vmem:[%s1038_s2 + $0x2c] sm:$0xf] %vm532_vm9, %v527_v42  ;;  %v374_v60 = vsub.f32 1.5, %v373_v34  ;;  %vm417_vm13 = vweird.f32 %v655_v45 }
 0x1c1   :  { %v657_v24 = vpop.eup %656  ;;  %658 = vrsqrt.f32 %v337_v31  ;;  %v485_v55 = vmul.f32 %v651_v19, %v484_v43  ;;  %539 = vst.msk [vmem:[%s1038_s2 + $0x18] sm:$0xf] %vm532_vm9, %v522_v54  ;;  %vm418_vm15 = vmor %vm416_vm14, %vm417_vm13  ;;  %vm476_vm4 = vweird.f32 %v337_v31 }
 0x1c2   :  { %v412_v61 = vmul.f32 %v655_v45, %v411_v51  ;;  %v491_v46 = vmul.f32 %v657_v24, %v976_v21  ;;  %v375_v14 = vmul.f32 %v653_v32, %v374_v60  ;;  %vm497_vm0 = vweird.f32 %v657_v24 }
 0x1c3   :  { %v489_v15 = vsel %vm488_vm10, %v651_v19, %v485_v55  ;;  %vm498_vm2 = vmor %vm496_vm1, %vm497_vm0 }
 0x1c4   :  { %v413_v62 = vmul.f32 0.5, %v412_v61  ;;  %v514_v0 = vmul.f32 %v489_v15, %v860_v56  ;;  %v492_v1 = vmul.f32 %v657_v24, %v491_v46  ;;  %v379_v2 = vsel %vm378_vm12, %v653_v32, %v375_v14 }
 0x1c5   :  { %v503_v58 = vmul.f32 %v379_v2, %v863_v59 }
 0x1c6   :  { %v414_v40 = vsub.f32 1.5, %v413_v62  ;;  %v530_v39 = vpack.c.bf16 %v514_v0, %v514_v0  ;;  %v493_v9 = vmul.f32 0.5, %v492_v1 }
 0x1c7   :  { %v659_v57 = vpop.eup %658  ;;  %v519_v56 = vpack.c.bf16 %v503_v58, %v503_v58 }
 0x1c8   :  { %v415_v52 = vmul.f32 %v655_v45, %v414_v40  ;;  %v471_v44 = vmul.f32 %v659_v57, %v337_v31  ;;  %547 = vst.msk [vmem:[%s1038_s2 + $0x38] sm:$0xf] %vm532_vm9, %v530_v39  ;;  %v494_v33 = vsub.f32 1.5, %v493_v9  ;;  %vm477_vm3 = vweird.f32 %v659_v57 }
 0x1c9   :  { %536 = vst.msk [vmem:[%s1038_s2 + $0xc] sm:$0xf] %vm532_vm9, %v519_v56  ;;  %vm478_vm5 = vmor %vm476_vm4, %vm477_vm3 }
 0x1ca   :  { %v419_v7 = vsel %vm418_vm15, %v655_v45, %v415_v52  ;;  %v472_v6 = vmul.f32 %v659_v57, %v471_v44  ;;  %v495_v11 = vmul.f32 %v657_v24, %v494_v33 }
 0x1cb   :  { %v507_v59 = vmul.f32 %v419_v7, %v879_v5 }
 0x1cc   :  { %v473_v10 = vmul.f32 0.5, %v472_v6  ;;  %v499_v13 = vsel %vm498_vm2, %v657_v24, %v495_v11 }
 0x1cd   :  { %v523_v12 = vpack.c.bf16 %v507_v59, %v507_v59  ;;  %v515_v25 = vmul.f32 %v499_v13, %v871_v63 }
 0x1ce   :  { %v474_v16 = vsub.f32 1.5, %v473_v10 }
 0x1cf   :  { %540 = vst.msk [vmem:[%s1038_s2 + $0x1c] sm:$0xf] %vm532_vm9, %v523_v12  ;;  %v531_v17 = vpack.c.bf16 %v515_v25, %v515_v25 }
 0x1d0   :  { %v475_v18 = vmul.f32 %v659_v57, %v474_v16 }
 0x1d1   :  { %548 = vst.msk [vmem:[%s1038_s2 + $0x3c] sm:$0xf] %vm532_vm9, %v531_v17 }
 0x1d2   :  { %v479_v5 = vsel %vm478_vm5, %v659_v57, %v475_v18 }
 0x1d3   :  { %v513_v22 = vmul.f32 %v479_v5, %v886_v8 }
 0x1d5   :  { %v529_v63 = vpack.c.bf16 %v513_v22, %v513_v22 }
 0x1d7   :  { %546 = vst.msk [vmem:[%s1038_s2 + $0x34] sm:$0xf] %vm532_vm9, %v529_v63 }

</bundles_post_ra>
